<compile_context>
chip_gen: v7x
topology: tpu7x:2x2x1
jax: 0.10.0
libtpu: 0.0.40
codegen_flags: <defaults>
</compile_context>

<pallas_src>
import functools

import jax
import jax.numpy as jnp
from jax import lax
from jax.experimental import pallas as pl
from jax.experimental.pallas import tpu as pltpu

LANE = 128            # lane alignment (last dim)
ADJ_SUBLANE = 32      # int8 sublane packing minimum (second-to-last A dim)
TM_TARGET = 1024      # dst-node tile target (rows of A / rows of out)
TK_TARGET = 2048      # src-node tile target (reduction axis)
VMEM_BUDGET = 24 * 1024 * 1024   # stay under v7x's 32 MiB default scoped VMEM


def _round_up(x, m):
    return (x + m - 1) // m * m


def _pad2d(a, rows, cols):
    return jnp.pad(a, ((0, rows - a.shape[0]), (0, cols - a.shape[1])))


# --------------------------------------------------------------------------
# Kernels
# --------------------------------------------------------------------------
def _agg_kernel(*refs, project, apply_relu):
    """acc[i] += bf16(A_int8[i,k]) @ Xs[k]  (f32 accumulation).

    Finalize (last src tile): y = (acc * norm_dst) [@ W] + b ; optional ReLU.
    """
    if project:
        adj_ref, xs_ref, ndst_ref, w_ref, b_ref, out_ref, acc_ref = refs
    else:
        adj_ref, xs_ref, ndst_ref, b_ref, out_ref, acc_ref = refs
        w_ref = None

    k = pl.program_id(1)

    @pl.when(k == 0)
    def _init():
        acc_ref[...] = jnp.zeros_like(acc_ref)

    # A lives in HBM as int8 (exact for a 0/1 adjacency); the int8->bf16 cast
    # is free VPU work while halving the dominant (HBM-bound) DMA stream.
    a_tile = adj_ref[...].astype(jnp.bfloat16)
    acc_ref[...] += jnp.dot(a_tile, xs_ref[...],
                            preferred_element_type=jnp.float32)

    @pl.when(k == pl.num_programs(1) - 1)
    def _finalize():
        h = acc_ref[...] * ndst_ref[...]                      # (TM, F) * (TM, 1)
        if project:
            h = jnp.dot(h.astype(w_ref.dtype), w_ref[...],
                        preferred_element_type=jnp.float32)
        y = h + b_ref[...]
        if apply_relu:
            y = jnp.maximum(y, 0.0)
        out_ref[...] = y.astype(out_ref.dtype)


def _project_kernel(x_ref, w_ref, o_ref):
    """Row-tiled X @ W (used for the project-before-aggregate path)."""
    o_ref[...] = jnp.dot(x_ref[...], w_ref[...],
                         preferred_element_type=jnp.float32).astype(o_ref.dtype)


def _project(x, w):
    """x: (n, f_in) bf16, w: (f_in, f_out) bf16; n is a multiple of 128."""
    n, f_in = x.shape
    f_out = w.shape[1]
    tp = 512                         # larger row tile amortizes per-step cost
    while n % tp:
        tp //= 2                     # n is a multiple of 128 -> terminates
    return pl.pallas_call(
        _project_kernel,
        out_shape=jax.ShapeDtypeStruct((n, f_out), jnp.bfloat16),
        grid_spec=pltpu.PrefetchScalarGridSpec(
            num_scalar_prefetch=0,
            grid=(n // tp,),
            in_specs=[pl.BlockSpec((tp, f_in), lambda i: (i, 0)),
                      pl.BlockSpec((f_in, f_out), lambda i: (0, 0))],
            out_specs=pl.BlockSpec((tp, f_out), lambda i: (i, 0)),
        ),
        compiler_params=pltpu.CompilerParams(
            dimension_semantics=("parallel",)),
    )(x, w)


# --------------------------------------------------------------------------
# VMEM budgeting (keeps enlarged tiles safe on v7x's 32 MiB scoped default)
# --------------------------------------------------------------------------
def _est_vmem(tm, tk, feat, f_in_p, f_out_p, project_in_kernel, out_bytes):
    a = 3 * tm * tk                       # int8 A tiles (up to 3 buffers)
    xs = 2 * tk * feat * 2                # bf16 Xs tiles, double-buffered
    acc = tm * feat * 4                   # f32 accumulator scratch
    out = 2 * tm * f_out_p * out_bytes    # output tiles
    w = (2 * f_in_p * f_out_p * 2) if project_in_kernel else 0
    misc = 2 * (tm * 4 + f_out_p * 4)     # dst-norm column + bias row
    return a + xs + acc + out + w + misc


# --------------------------------------------------------------------------
# One GraphConv layer
# --------------------------------------------------------------------------
def graph_conv(adj, x, w, b, *, relu, out_dtype=jnp.float32):
    """DGL GraphConv(norm='both', allow_zero_in_degree=True) forward."""
    n_dst, n_src = adj.shape
    f_in, f_out = w.shape
    b = jnp.asarray(b, jnp.float32).reshape(1, -1)

    f_in_p = _round_up(f_in, LANE)
    f_out_p = _round_up(f_out, LANE)
    project_first = f_out < f_in           # DGL-style reorder (layer 2)
    feat = f_out_p if project_first else f_in_p
    out_bytes = jnp.dtype(out_dtype).itemsize

    # ---- tile selection ----------------------------------------------------
    if n_dst >= 2 * TM_TARGET:
        tm = TM_TARGET
    else:
        # Aim for >=2 dst tiles (feeds both v7x TensorCores), subject to the
        # int8 (32, 128) packing minimum; harmless on single-TC v5e/v6e.
        tm = max(ADJ_SUBLANE, _round_up((n_dst + 1) // 2, ADJ_SUBLANE))
    tk = TK_TARGET if n_src >= TK_TARGET else _round_up(max(n_src, LANE), LANE)

    while (_est_vmem(tm, tk, feat, f_in_p, f_out_p, not project_first,
                     out_bytes) > VMEM_BUDGET and tk > LANE):
        tk = max(LANE, _round_up(tk // 2, LANE))
    while (_est_vmem(tm, tk, feat, f_in_p, f_out_p, not project_first,
                     out_bytes) > VMEM_BUDGET and tm > ADJ_SUBLANE):
        tm = max(ADJ_SUBLANE, _round_up(tm // 2, ADJ_SUBLANE))

    n_dst_p = _round_up(n_dst, tm)
    n_src_p = _round_up(n_src, tk)

    # ---- prologue: ONE pass over the adjacency -----------------------------
    # Cast/pad A to compact int8 once; both degree vectors are then computed
    # from the compact copy, so the full f32 adjacency is read a single time.
    adj_p = _pad2d(adj.astype(jnp.int8), n_dst_p, n_src_p)
    deg_src = jnp.maximum(jnp.sum(adj_p, axis=0, dtype=jnp.float32), 1.0)
    deg_dst = jnp.maximum(jnp.sum(adj_p, axis=1, dtype=jnp.float32), 1.0)
    norm_src = lax.rsqrt(deg_src)[:, None]              # (n_src_p, 1)
    norm_dst = lax.rsqrt(deg_dst)[:, None]              # (n_dst_p, 1)

    x_p = _pad2d(x.astype(jnp.float32), n_src_p, f_in_p)
    w_p = _pad2d(w.astype(jnp.float32), f_in_p, f_out_p)
    b_p = _pad2d(b, 1, f_out_p)

    # Hoisted out of the tiled loop: source-side scaling (and, when f_out <
    # f_in, the projection) happen once per node, not once per dst tile.
    xs = x_p * norm_src                                  # D_src^{-1/2} X (f32)
    if project_first:
        xs = _project(xs.astype(jnp.bfloat16), w_p.astype(jnp.bfloat16))
    else:
        xs = xs.astype(jnp.bfloat16)     # bf16 MXU operands, f32 accumulation

    # ---- tiled aggregation --------------------------------------------------
    grid = (n_dst_p // tm, n_src_p // tk)
    adj_spec_kwargs = {}
    if grid[0] * grid[1] >= 3:
        # VMEM is nearly empty; a 3rd buffer on the dominant A stream smooths
        # DMA latency jitter at essentially zero cost.
        adj_spec_kwargs["pipeline_mode"] = pl.Buffered(3)

    kern = functools.partial(_agg_kernel, project=not project_first,
                             apply_relu=relu)
    in_specs = [
        pl.BlockSpec((tm, tk), lambda i, k: (i, k), **adj_spec_kwargs),  # A
        pl.BlockSpec((tk, feat), lambda i, k: (k, 0)),                   # Xs
        pl.BlockSpec((tm, 1), lambda i, k: (i, 0)),                      # norm_dst
    ]
    inputs = [adj_p, xs, norm_dst]
    if not project_first:
        in_specs.append(pl.BlockSpec((f_in_p, f_out_p), lambda i, k: (0, 0)))
        inputs.append(w_p.astype(jnp.bfloat16))
    in_specs.append(pl.BlockSpec((1, f_out_p), lambda i, k: (0, 0)))
    inputs.append(b_p)

    out_p = pl.pallas_call(
        kern,
        out_shape=jax.ShapeDtypeStruct((n_dst_p, f_out_p), out_dtype),
        grid_spec=pltpu.PrefetchScalarGridSpec(
            num_scalar_prefetch=0,
            grid=grid,
            in_specs=in_specs,
            out_specs=pl.BlockSpec((tm, f_out_p), lambda i, k: (i, 0)),
            scratch_shapes=[pltpu.VMEM((tm, feat), jnp.float32)],
        ),
        compiler_params=pltpu.CompilerParams(
            dimension_semantics=("parallel", "arbitrary")),
    )(*inputs)

    return out_p[:n_dst, :f_out]


# --------------------------------------------------------------------------
# Full GCN forward
# --------------------------------------------------------------------------
def gcn_forward(adj1, adj2, x, params):
    """GCN.forward(mfgs, x):
         h = relu(conv1(mfg0, (x, x[:n_dst1])))
         h = conv2(mfg1, (h, h[:n_dst2]))
       The dst-feature half of each tuple only defines the dst-node count
       (handled here by the adjacency shapes) and does not enter the math.
    """
    w1, b1, w2, b2 = params
    # Hidden activations are bf16: they are re-consumed as bf16 MXU operands
    # by layer 2, halving layer-1 writeback and layer-2 feature reads.
    h = graph_conv(adj1, x, w1, b1, relu=True, out_dtype=jnp.bfloat16)
    out = graph_conv(adj2, h, w2, b2, relu=False, out_dtype=jnp.float32)
    return out


def glorot(key, shape):
    fan_in, fan_out = shape
    limit = jnp.sqrt(6.0 / (fan_in + fan_out))
    return jax.random.uniform(key, shape, jnp.float32, -limit, limit)


if __name__ == "__main__":
    # Small synthetic MFG sampling structure.
    n_src1, n_dst1, n_dst2 = 32, 16, 8
    in_feats, h_feats, num_classes = 16, 32, 8

    key = jax.random.PRNGKey(0)
    k_x, k_a1, k_a2, k_w1, k_w2 = jax.random.split(key, 5)

    # Node features of the outermost (source) frontier.
    x = jax.random.normal(k_x, (n_src1, in_feats), jnp.float32)

    # Dense block adjacencies (dst x src), 0/1.
    adj1 = jax.random.bernoulli(k_a1, 0.3, (n_dst1, n_src1)).astype(jnp.float32)
    adj2 = jax.random.bernoulli(k_a2, 0.3, (n_dst2, n_dst1)).astype(jnp.float32)

    # Deterministic parameters (DGL GraphConv: xavier-uniform W, zero bias).
    w1 = glorot(k_w1, (in_feats, h_feats))
    b1 = jnp.zeros((1, h_feats), jnp.float32)
    w2 = glorot(k_w2, (h_feats, num_classes))
    b2 = jnp.zeros((1, num_classes), jnp.float32)
    params = (w1, b1, w2, b2)

    out = gcn_forward(adj1, adj2, x, params)
    jax.block_until_ready(out)
    assert out.shape == (n_dst2, num_classes)
    print("KERNEL_OK")
</pallas_src>

<mosaic_0001>
module attributes {stable_mosaic.version = 11 : i64} {
  func.func @_agg_kernel(%arg0: i32, %arg1: i32, %arg2: memref<32x128xi8, #tpu.memory_space<vmem>>, %arg3: memref<128x128xbf16, #tpu.memory_space<vmem>>, %arg4: memref<32x1xf32, #tpu.memory_space<vmem>>, %arg5: memref<128x128xbf16, #tpu.memory_space<vmem>>, %arg6: memref<1x128xf32, #tpu.memory_space<vmem>>, %arg7: memref<32x128xbf16, #tpu.memory_space<vmem>>, %arg8: memref<32x128xf32, #tpu.memory_space<vmem>>) attributes {dimension_semantics = [#tpu.dimension_semantics<parallel>, #tpu.dimension_semantics<arbitrary>], iteration_bounds = array<i64: 1, 1>, scalar_prefetch = 0 : i64, scratch_operands = 1 : i64, tpu.core_type = #tpu.core_type<tc>, window_params = [{transform_indices = @transform_0, window_bounds = array<i64: 32, 128>}, {transform_indices = @transform_1, window_bounds = array<i64: 128, 128>}, {transform_indices = @transform_2, window_bounds = array<i64: 32, 1>}, {pipeline_mode = #tpu.pipeline_mode<synchronous>, transform_indices = @transform_3, window_bounds = array<i64: 128, 128>}, {pipeline_mode = #tpu.pipeline_mode<synchronous>, transform_indices = @transform_4, window_bounds = array<i64: 1, 128>}, {transform_indices = @transform_5, window_bounds = array<i64: 32, 128>}]} {
    %c0_i32 = arith.constant 0 : i32
    %0 = arith.cmpi eq, %arg1, %c0_i32 : i32
    %1 = arith.extui %0 : i1 to i32
    %c0_i32_0 = arith.constant 0 : i32
    %2 = arith.cmpi ne, %1, %c0_i32_0 : i32
    scf.if %2 {
      %cst_10 = arith.constant 0.000000e+00 : f32
      %13 = vector.broadcast %cst_10 : f32 to vector<32x128xf32>
      %c0_11 = arith.constant 0 : index
      %c0_12 = arith.constant 0 : index
      %14 = vector.load %arg8[%c0_11, %c0_12] : memref<32x128xf32, #tpu.memory_space<vmem>>, vector<32x128xf32>
      tpu.vector_store %arg8[%c0_11, %c0_12], %13 {strides = array<i32>} : memref<32x128xf32, #tpu.memory_space<vmem>>, vector<32x128xf32>,
    } else {
    }
    %c0 = arith.constant 0 : index
    %c0_1 = arith.constant 0 : index
    %3 = vector.load %arg2[%c0, %c0_1] : memref<32x128xi8, #tpu.memory_space<vmem>>, vector<32x128xi8>
    %4 = arith.sitofp %3 : vector<32x128xi8> to vector<32x128xbf16>
    %c0_2 = arith.constant 0 : index
    %c0_3 = arith.constant 0 : index
    %5 = vector.load %arg8[%c0_2, %c0_3] : memref<32x128xf32, #tpu.memory_space<vmem>>, vector<32x128xf32>
    %c0_4 = arith.constant 0 : index
    %c0_5 = arith.constant 0 : index
    %6 = vector.load %arg3[%c0_4, %c0_5] : memref<128x128xbf16, #tpu.memory_space<vmem>>, vector<128x128xbf16>
    %cst = arith.constant dense<0.000000e+00> : vector<32x128xf32>
    %7 = tpu.matmul %4, %6, %cst {dimension_numbers = #tpu.dot_dimension_numbers<[1], [0], [0], [1], [0, 0, 1, 1], [], []>} : vector<32x128xbf16>, vector<128x128xbf16>, vector<32x128xf32> -> vector<32x128xf32>
    %8 = arith.addf %5, %7 : vector<32x128xf32>
    %c0_6 = arith.constant 0 : index
    %c0_7 = arith.constant 0 : index
    %9 = vector.load %arg8[%c0_6, %c0_7] : memref<32x128xf32, #tpu.memory_space<vmem>>, vector<32x128xf32>
    tpu.vector_store %arg8[%c0_6, %c0_7], %8 {strides = array<i32>} : memref<32x128xf32, #tpu.memory_space<vmem>>, vector<32x128xf32>,
    %c0_i32_8 = arith.constant 0 : i32
    %10 = arith.cmpi eq, %arg1, %c0_i32_8 : i32
    %11 = arith.extui %10 : i1 to i32
    %c0_i32_9 = arith.constant 0 : i32
    %12 = arith.cmpi ne, %11, %c0_i32_9 : i32
    scf.if %12 {
      %c0_10 = arith.constant 0 : index
      %c0_11 = arith.constant 0 : index
      %13 = vector.load %arg8[%c0_10, %c0_11] : memref<32x128xf32, #tpu.memory_space<vmem>>, vector<32x128xf32>
      %c0_12 = arith.constant 0 : index
      %c0_13 = arith.constant 0 : index
      %14 = vector.load %arg4[%c0_12, %c0_13] : memref<32x1xf32, #tpu.memory_space<vmem>>, vector<32x1xf32>
      %15 = vector.broadcast %14 : vector<32x1xf32> to vector<32x128xf32>
      %16 = arith.mulf %13, %15 : vector<32x128xf32>
      %17 = arith.truncf %16 : vector<32x128xf32> to vector<32x128xbf16>
      %c0_14 = arith.constant 0 : index
      %c0_15 = arith.constant 0 : index
      %18 = vector.load %arg5[%c0_14, %c0_15] : memref<128x128xbf16, #tpu.memory_space<vmem>>, vector<128x128xbf16>
      %cst_16 = arith.constant dense<0.000000e+00> : vector<32x128xf32>
      %19 = tpu.matmul %17, %18, %cst_16 {dimension_numbers = #tpu.dot_dimension_numbers<[1], [0], [0], [1], [0, 0, 1, 1], [], []>} : vector<32x128xbf16>, vector<128x128xbf16>, vector<32x128xf32> -> vector<32x128xf32>
      %c0_17 = arith.constant 0 : index
      %c0_18 = arith.constant 0 : index
      %20 = vector.load %arg6[%c0_17, %c0_18] : memref<1x128xf32, #tpu.memory_space<vmem>>, vector<1x128xf32>
      %21 = vector.broadcast %20 : vector<1x128xf32> to vector<32x128xf32>
      %22 = arith.addf %19, %21 : vector<32x128xf32>
      %cst_19 = arith.constant 0.000000e+00 : f32
      %23 = vector.broadcast %cst_19 : f32 to vector<32x128xf32>
      %24 = arith.maximumf %22, %23 : vector<32x128xf32>
      %25 = arith.truncf %24 : vector<32x128xf32> to vector<32x128xbf16>
      %c0_20 = arith.constant 0 : index
      %c0_21 = arith.constant 0 : index
      %26 = vector.load %arg7[%c0_20, %c0_21] : memref<32x128xbf16, #tpu.memory_space<vmem>>, vector<32x128xbf16>
      tpu.vector_store %arg7[%c0_20, %c0_21], %25 {strides = array<i32>} : memref<32x128xbf16, #tpu.memory_space<vmem>>, vector<32x128xbf16>,
    } else {
    }
    return
  }
  func.func @transform_0(%arg0: i32, %arg1: i32) -> (i32, i32) {
    %c0_i32 = arith.constant 0 : i32
    return %arg0, %arg1 : i32, i32
  }
  func.func @transform_1(%arg0: i32, %arg1: i32) -> (i32, i32) {
    %c0_i32 = arith.constant 0 : i32
    %c0_i32_0 = arith.constant 0 : i32
    return %arg1, %c0_i32 : i32, i32
  }
  func.func @transform_2(%arg0: i32, %arg1: i32) -> (i32, i32) {
    %c0_i32 = arith.constant 0 : i32
    %c0_i32_0 = arith.constant 0 : i32
    return %arg0, %c0_i32 : i32, i32
  }
  func.func @transform_3(%arg0: i32, %arg1: i32) -> (i32, i32) {
    %c0_i32 = arith.constant 0 : i32
    %c0_i32_0 = arith.constant 0 : i32
    %c0_i32_1 = arith.constant 0 : i32
    return %c0_i32, %c0_i32_0 : i32, i32
  }
  func.func @transform_4(%arg0: i32, %arg1: i32) -> (i32, i32) {
    %c0_i32 = arith.constant 0 : i32
    %c0_i32_0 = arith.constant 0 : i32
    %c0_i32_1 = arith.constant 0 : i32
    return %c0_i32, %c0_i32_0 : i32, i32
  }
  func.func @transform_5(%arg0: i32, %arg1: i32) -> (i32, i32) {
    %c0_i32 = arith.constant 0 : i32
    %c0_i32_0 = arith.constant 0 : i32
    return %arg0, %c0_i32 : i32, i32
  }
}

</mosaic_0001>

<bundles_post_ra>
// kernel: tpu_custom_call.1
= control target key start
LH: loop header
LB: loop body
LE: loop exit
PB: predicated region body
PF: predicated region fallthrough
CT: control target
= control target key end

     0   :  { %10 = vsyncpa [#allocation4], 0  ;;  %s676_s0 = inlined_call_operand.vmem [shape: s8[32,128], index: 0, kind: input, shape index: {}]   ;;  %s677_s1 = inlined_call_operand.hbm [shape: bf16[128,128], index: 1, kind: input, shape index: {}]   ;;  %s678_s2 = inlined_call_operand.vmem [shape: f32[32,1], index: 2, kind: input, shape index: {}]   ;;  %s679_s3 = inlined_call_operand.hbm [shape: bf16[128,128], index: 3, kind: input, shape index: {}]   ;;  %s680_s4 = inlined_call_operand.vmem [shape: f32[1,128], index: 4, kind: input, shape index: {}]   ;;  %s681_s5 = inlined_call_operand.hbm [shape: bf16[32,128], index: 5, kind: output, shape index: {}]  }
   0x1   :  { %11 = vsyncpa [#allocation7], 0 }
   0x2   :  { %12 = vsyncpa [#allocation5], 0  ;;  %s577_s18 = smov [#allocation3]   ;;  %s505_s22 = scalar_lea.hbm %s677_s1, 1024 }
   0x3   :  { %s20_s19 = sshll.u32 %s577_s18, 4  ;;  %p506_p0 = scmp.ne.s32.totalorder %s677_s1, %s505_s22  ;;  %s21_s19 = int_to_ptr.vmem [resolvable:$true] %s20_s19 }
   0x4   :  { %p509_p1 = scmp.lt.u32.totalorder %s505_s22, %s677_s1 }
   0x6   :  { %p511_p2 = pnand %p509_p1, %p506_p0 }
   0x8   :  { %514 = shalt.err (!%p511_p2)
}
   0x9   :  { %s515_s27 = scalar_lea.vmem %s21_s19, 1024  ;;  %p520_p4 = scmp.lt.s32.totalorder %s21_s19, %s21_s19 }
   0xa   :  { %p516_p3 = scmp.ne.s32.totalorder %s21_s19, %s515_s27  ;;  %p521_p5 = scmp.lt.s32.totalorder %s515_s27, %s515_s27 }
   0xc   :  { %p522_p6 = por %p521_p5, %p520_p4 }
   0xe   :  { %p523_p7 = pnand %p522_p6, %p516_p3 }
  0x10   :  { %526 = shalt.err (!%p523_p7)
}
  0x11   :  { %s578_s28 = smov 64   ;;  %s579_s29 = smov 4  }
  0x12   :  { %26 = dma.hbm_to_vmem [thread:$0]  %s677_s1, 1024, %s21_s19, [#allocation4], %s578_s28, %s578_s28, %s579_s29  }
  0x13   :  { %s580_s7 = smov [#allocation6]   ;;  %s527_s11 = scalar_lea.hbm %s679_s3, 1024 }
  0x14   :  { %s34_s8 = sshll.u32 %s580_s7, 4  ;;  %p528_p8 = scmp.ne.s32.totalorder %s679_s3, %s527_s11  ;;  %s35_s8 = int_to_ptr.vmem [resolvable:$true] %s34_s8 }
  0x15   :  { %p531_p9 = scmp.lt.u32.totalorder %s527_s11, %s679_s3 }
  0x17   :  { %p533_p10 = pnand %p531_p9, %p528_p8 }
  0x19   :  { %536 = shalt.err (!%p533_p10)
}
  0x1a   :  { %s537_s16 = scalar_lea.vmem %s35_s8, 1024  ;;  %p542_p12 = scmp.lt.s32.totalorder %s35_s8, %s35_s8 }
  0x1b   :  { %p538_p11 = scmp.ne.s32.totalorder %s35_s8, %s537_s16  ;;  %p543_p13 = scmp.lt.s32.totalorder %s537_s16, %s537_s16 }
  0x1d   :  { %p544_p0 = por %p543_p13, %p542_p12 }
  0x1f   :  { %p545_p1 = pnand %p544_p0, %p538_p11 }
  0x21   :  { %548 = shalt.err (!%p545_p1)
}
  0x22   :  { %40 = dma.hbm_to_vmem [thread:$0]  %s679_s3, 1024, %s35_s8, [#allocation7], %s578_s28, %s578_s28, %s579_s29  }
  0x23   :  { %571 = dma.done.wait [#allocation4], 1024  }
  0x24   :  { %572 = vsyncadd [#allocation4], 4294966272 }
  0x25   :  { %573 = dma.done.wait [#allocation7], 1024  }
  0x26   :  { %574 = vsyncadd [#allocation7], 4294966272  ;;  %v581_v0 = vmov 0   ;;  %v489_v1 = vld [vmem:[#allocation3] sm:$0xff]   ;;  %v490_v2 = vld [vmem:[#allocation3 + $0x8] sm:$0xff]   ;;  %s582_s27 = smov [#allocation8]  }
  0x27   :  { %487 = vset.pattern.permute.xlu0 %v581_v0  ;;  %488 = vset.pattern.permute.xlu1 %v581_v0  ;;  %v491_v3 = vld [vmem:[#allocation3 + $0x10] sm:$0xff]   ;;  %v492_v4 = vld [vmem:[#allocation3 + $0x18] sm:$0xff]   ;;  %v58_v5 = vld [vmem:[%s676_s0] sm:$0xff]  ;;  %s372_s30 = sshll.u32 %s582_s27, 4  ;;  %s373_s30 = int_to_ptr.vmem [resolvable:$true] %s372_s30 }
  0x28   :  { %441 = vmatprep.subr.bf16.mxu0 %v489_v1  ;;  %v193_v6 = vld [vmem:[%s678_s2] sm:$0xff]  ;;  %v195_v7 = vld [vmem:[%s678_s2 + $0x10] sm:$0xff]  ;;  %v59_v8 = vunpack.c.l.s8.bf16 %v58_v5  ;;  %v194_v9 = vld [vmem:[%s678_s2 + $0x8] sm:$0xff]  ;;  %v60_v21 = vunpack.c.h.s8.bf16 %v58_v5  ;;  %p554_p3 = scmp.lt.s32.totalorder %s373_s30, %s373_s30 }
  0x29   :  { %442 = vmatpush3.bf16.msra.mxu0 %v489_v1  ;;  %199 = vperm.xlu0 %487, %v193_v6   ;;  %v196_v10 = vld [vmem:[%s678_s2 + $0x18] sm:$0xff]  ;;  %v497_v11 = vld [vmem:[#allocation6] sm:$0xff]   ;;  %v498_v12 = vld [vmem:[#allocation6 + $0x8] sm:$0xff]  }
  0x2a   :  { %443 = vmatprep.subr.bf16.mxu0 %v490_v2  ;;  %209 = vperm.xlu1 %488, %v195_v7   ;;  %v493_v13 = vld [vmem:[#allocation3 + $0x20] sm:$0xff]   ;;  %v494_v14 = vld [vmem:[#allocation3 + $0x28] sm:$0xff]   ;;  %v499_v15 = vld [vmem:[#allocation6 + $0x10] sm:$0xff]  }
  0x2b   :  { %457 = vmatprep.mubr.bf16.mxu0 %v59_v8  ;;  %461 = vmatprep.subr.bf16.mxu1 %v497_v11  ;;  %v500_v16 = vld [vmem:[#allocation6 + $0x18] sm:$0xff]   ;;  %v495_v17 = vld [vmem:[#allocation3 + $0x30] sm:$0xff]   ;;  %v501_v18 = vld [vmem:[#allocation6 + $0x20] sm:$0xff]  }
  0x2c   :  { %462 = vmatpush3.bf16.msra.mxu1 %v497_v11  ;;  %v496_v19 = vld [vmem:[#allocation3 + $0x38] sm:$0xff]   ;;  %v502_v20 = vld [vmem:[#allocation6 + $0x28] sm:$0xff]   ;;  %v503_v22 = vld [vmem:[#allocation6 + $0x30] sm:$0xff]  }
  0x2d   :  { %444 = vmatpush3.bf16.msra.mxu0 %v490_v2  ;;  %204 = vperm.xlu0 %487, %v194_v9   ;;  %v504_v23 = vld [vmem:[#allocation6 + $0x38] sm:$0xff]   ;;  %v393_v38 = vld [vmem:[%s680_s4] ss:$0 sm:$0xff]  ;;  %s549_s4 = scalar_lea.vmem %s373_s30, 256 }
  0x2e   :  { %445 = vmatprep.subr.bf16.mxu0 %v491_v3  ;;  %214 = vperm.xlu1 %488, %v196_v10   ;;  %p550_p2 = scmp.ne.s32.totalorder %s373_s30, %s549_s4  ;;  %p555_p4 = scmp.lt.s32.totalorder %s549_s4, %s549_s4 }
  0x2f   :  { %463 = vmatprep.subr.bf16.mxu1 %v498_v12 }
  0x30   :  { %464 = vmatpush3.bf16.msra.mxu1 %v498_v12  ;;  %p556_p5 = por %p555_p4, %p554_p3 }
  0x31   :  { %446 = vmatpush3.bf16.msra.mxu0 %v491_v3  ;;  %465 = vmatprep.subr.bf16.mxu1 %v499_v15 }
  0x32   :  { %447 = vmatprep.subr.bf16.mxu0 %v492_v4  ;;  %p557_p6 = pnand %p556_p5, %p550_p2 }
  0x34   :  { %466 = vmatpush3.bf16.msra.mxu1 %v499_v15 }
  0x35   :  { %448 = vmatpush3.bf16.msra.mxu0 %v492_v4  ;;  %467 = vmatprep.subr.bf16.mxu1 %v500_v16 }
  0x36   :  { %449 = vmatprep.subr.bf16.mxu0 %v493_v13 }
  0x38   :  { %468 = vmatpush3.bf16.msra.mxu1 %v500_v16 }
  0x39   :  { %450 = vmatpush3.bf16.msra.mxu0 %v493_v13  ;;  %469 = vmatprep.subr.bf16.mxu1 %v501_v18 }
  0x3a   :  { %451 = vmatprep.subr.bf16.mxu0 %v494_v14 }
  0x3c   :  { %470 = vmatpush3.bf16.msra.mxu1 %v501_v18 }
  0x3d   :  { %452 = vmatpush3.bf16.msra.mxu0 %v494_v14  ;;  %471 = vmatprep.subr.bf16.mxu1 %v502_v20 }
  0x3e   :  { %453 = vmatprep.subr.bf16.mxu0 %v495_v17 }
  0x40   :  { %472 = vmatpush3.bf16.msra.mxu1 %v502_v20 }
  0x41   :  { %454 = vmatpush3.bf16.msra.mxu0 %v495_v17  ;;  %473 = vmatprep.subr.bf16.mxu1 %v503_v22 }
  0x42   :  { %455 = vmatprep.subr.bf16.mxu0 %v496_v19 }
  0x44   :  { %474 = vmatpush3.bf16.msra.mxu1 %v503_v22 }
  0x45   :  { %456 = vmatpush3.bf16.msra.mxu0 %v496_v19  ;;  %475 = vmatprep.subr.bf16.mxu1 %v504_v23 }
  0x48   :  { %458 = vmatmul.mubr.bf16.vlgmr.msra.gmra.mrb[0].mxu0 %v60_v21  ;;  %476 = vmatpush3.bf16.msra.mxu1 %v504_v23 }
  0xa8   :  { %v200_v25 = vpop.permute.xlu0 %199 }
  0xa9   :  { %v210_v24 = vpop.permute.xlu1 %209 }
  0xac   :  { %v205_v30 = vpop.permute.xlu0 %204 }
  0xad   :  { %v215_v28 = vpop.permute.xlu1 %214 }
 0x11b   :  { %v459_v26 = vpop.f32.mrb[0].mxu0 }
 0x11c   :  { %v163_v27 = vpop.f32.mrb[1].mxu0  ;;  %v219_v31 = vmul.f32 %v459_v26, %v210_v24 }
 0x11d   :  { %v460_v29 = vpop.f32.mrb[2].mxu0  ;;  %v217_v34 = vmul.f32 %v200_v25, %v163_v27 }
 0x11e   :  { %v220_v32 = vmul.f32 %v460_v29, %v215_v28  ;;  %v166_v33 = vpop.f32.mrb[3].mxu0 }
 0x11f   :  { %v218_v35 = vmul.f32 %v205_v30, %v166_v33 }
 0x120   :  { %v222_v36 = vpack.c.bf16 %v220_v32, %v219_v31 }
 0x121   :  { %v221_v37 = vpack.c.bf16 %v218_v35, %v217_v34 }
 0x123   :  { %477 = vmatprep.mubr.bf16.mxu1 %v221_v37 }
 0x124   :  { %478 = vmatmul.mubr.bf16.vlgmr.msra.gmra.mrb[0].mxu1 %v222_v36 }
 0x1f7   :  { %v479_v39 = vpop.f32.mrb[0].mxu1 }
 0x1f8   :  { %v337_v40 = vadd.f32 %v479_v39, %v393_v38  ;;  %v328_v41 = vpop.f32.mrb[1].mxu1 }
 0x1f9   :  { %v329_v42 = vadd.f32 %v393_v38, %v328_v41  ;;  %v480_v43 = vpop.f32.mrb[2].mxu1 }
 0x1fa   :  { %v340_v44 = vadd.f32 %v480_v43, %v393_v38  ;;  %v331_v45 = vpop.f32.mrb[3].mxu1  ;;  %v345_v47 = vmax.f32 %v337_v40, 0.0 }
 0x1fb   :  { %v332_v46 = vadd.f32 %v393_v38, %v331_v45  ;;  %v343_v49 = vmax.f32 %v329_v42, 0.0 }
 0x1fc   :  { %v346_v48 = vmax.f32 %v340_v44, 0.0 }
 0x1fd   :  { %v344_v50 = vmax.f32 %v332_v46, 0.0 }
 0x1fe   :  { %v418_v51 = vpack.c.bf16 %v346_v48, %v345_v47 }
 0x1ff   :  { %v413_v52 = vpack.c.bf16 %v344_v50, %v343_v49 }
 0x200   :  { %420 = vst [vmem:[#allocation8 + $0x8] sm:$0xff] %v418_v51  }
 0x201   :  { %414 = vst [vmem:[#allocation8] sm:$0xff] %v413_v52  }
 0x202   :  { %560 = shalt.err (!%p557_p6)
}
 0x203   :  { %s561_s8 = scalar_lea.hbm %s681_s5, 256 }
 0x204   :  { %p562_p7 = scmp.ne.s32.totalorder %s681_s5, %s561_s8  ;;  %p565_p8 = scmp.lt.u32.totalorder %s561_s8, %s681_s5 }
 0x206   :  { %p567_p9 = pnand %p565_p8, %p562_p7 }
 0x208   :  { %570 = shalt.err (!%p567_p9)
}
 0x209   :  { %378 = dma.vmem_to_hbm [thread:$0]  %s373_s30, 256, %s681_s5, [#allocation5], %s578_s28, %s578_s28, %s579_s29  }
 0x20a   :  { %575 = dma.done.wait [#allocation5], 256  }
 0x20b   :  { %576 = vsyncadd [#allocation5], 4294967040 }
 0x20c   :  { %382 = vsyncpa [#allocation4], 1 }
 0x20d   :  { %383 = vsyncpa [#allocation7], 1 }
 0x20e   :  { %384 = vsyncpa [#allocation5], 1 }

</bundles_post_ra>
